<compile_context>
chip_gen: v7x
topology: tpu7x:2x2x1
jax: 0.10.0
libtpu: 0.0.40
codegen_flags: <defaults>
</compile_context>

<pallas_src>
import functools

import jax
import jax.numpy as jnp
from jax.experimental import pallas as pl
from jax.experimental.pallas import tpu as pltpu


# ----------------------------------------------------------------------------
# shared helpers
# ----------------------------------------------------------------------------
def _layernorm(x, w, b, eps):
    # one-pass variance: the two reductions are independent (XLU overlap)
    m = jnp.mean(x, axis=-1, keepdims=True)
    m2 = jnp.mean(x * x, axis=-1, keepdims=True)
    var = m2 - m * m
    return (x - m) * jax.lax.rsqrt(var + eps) * w + b


def _row_block(n, target=512):
    """Row tile (multiple of 8, <= target, >= 2 grid blocks when possible) and
    the padded row count."""
    n8 = ((n + 7) // 8) * 8
    if n8 <= 8:
        rb = n8
    else:
        rb = max(8, min(target, ((n8 // 2 + 7) // 8) * 8))
    n_pad = ((n8 + rb - 1) // rb) * rb
    return rb, n_pad


def _time_chunk(t, target=16):
    """Timesteps per grid step (<= target), chosen to minimize time padding."""
    if t <= target:
        return t
    best, best_pad = target, (-t) % target
    for cand in range(target, max(1, target // 2) - 1, -1):
        pad = (-t) % cand
        if pad < best_pad:
            best, best_pad = cand, pad
            if pad == 0:
                break
    return best


def _unroll_factor(rows, cols, tc, vreg_budget=48):
    """Full unroll only if the unrolled per-step working set fits in vregs."""
    vregs_per_step = max(1, (rows * cols) // 1024)
    if vregs_per_step * tc <= vreg_budget:
        return True
    return max(1, min(tc, vreg_budget // vregs_per_step))


_VMEM_LIMIT = 32 * 1024 * 1024  # safe on v5e/v6e and within v7x's 64 MiB budget


# ----------------------------------------------------------------------------
# Kernel 1: row-tiled fused  [pre-LN] -> matmul -> [bias] -> [post-LN]
#   (used here for: input LayerNorm + emb @ wx of layer 0)
# ----------------------------------------------------------------------------
def fused_rowwise_kernel(*refs, eps, pre_ln, add_bias, post_ln):
    refs = list(refs)
    o_ref = refs.pop()
    it = iter(refs)
    x_ref = next(it)
    w_ref = next(it)

    x = x_ref[...].astype(jnp.float32)
    if pre_ln:
        pw = next(it)
        pb = next(it)
        x = _layernorm(x, pw[...].astype(jnp.float32),
                       pb[...].astype(jnp.float32), eps)

    y = jnp.dot(x, w_ref[...].astype(jnp.float32),
                preferred_element_type=jnp.float32)

    if add_bias:
        b = next(it)
        y = y + b[...].astype(jnp.float32)

    if post_ln:
        qw = next(it)
        qb = next(it)
        y = _layernorm(y, qw[...].astype(jnp.float32),
                       qb[...].astype(jnp.float32), eps)

    o_ref[...] = y.astype(o_ref.dtype)


def fused_rowwise(x2d, w, *, bias=None, pre_ln=None, post_ln=None, eps=1e-5,
                  out_dtype=None):
    n, din = x2d.shape
    dout = w.shape[1]
    rb, n_pad = _row_block(n)
    out_dtype = out_dtype or x2d.dtype

    if n_pad != n:  # zero rows are per-row independent; sliced off below
        x2d = jnp.concatenate(
            [x2d, jnp.zeros((n_pad - n, din), x2d.dtype)], axis=0)

    inputs = [x2d, w]
    in_specs = [
        pl.BlockSpec((rb, din), lambda i: (i, 0)),
        pl.BlockSpec((din, dout), lambda i: (0, 0)),
    ]
    if pre_ln is not None:
        pw, pb = pre_ln
        inputs += [pw.reshape(1, -1), pb.reshape(1, -1)]
        in_specs += [pl.BlockSpec((1, din), lambda i: (0, 0))] * 2
    if bias is not None:
        inputs.append(bias.reshape(1, -1))
        in_specs.append(pl.BlockSpec((1, dout), lambda i: (0, 0)))
    if post_ln is not None:
        qw, qb = post_ln
        inputs += [qw.reshape(1, -1), qb.reshape(1, -1)]
        in_specs += [pl.BlockSpec((1, dout), lambda i: (0, 0))] * 2

    kernel = functools.partial(
        fused_rowwise_kernel, eps=eps,
        pre_ln=pre_ln is not None,
        add_bias=bias is not None,
        post_ln=post_ln is not None)

    out = pl.pallas_call(
        kernel,
        grid=(n_pad // rb,),
        in_specs=in_specs,
        out_specs=pl.BlockSpec((rb, dout), lambda i: (i, 0)),
        out_shape=jax.ShapeDtypeStruct((n_pad, dout), out_dtype),
        compiler_params=pltpu.CompilerParams(
            dimension_semantics=("parallel",),
            vmem_limit_bytes=_VMEM_LIMIT),
    )(*inputs)
    return out[:n] if n_pad != n else out


# ----------------------------------------------------------------------------
# Kernel 2: LSTM recurrence + fused epilogue matmul
#   - gates_x for THIS layer is precomputed (2-D, time-major rows).
#   - h / c live in registers through the chunk; scratch written once/chunk.
#   - after the chunk, the epilogue matmul on the chunk's h emits either the
#     NEXT layer's gates_x, or the final Linear(+bias)+output-LayerNorm.
# ----------------------------------------------------------------------------
def lstm_fused_kernel(*refs, eps, hidden_dim, brows, tc, t_valid, needs_mask,
                      unroll, has_bias, has_post_ln):
    refs = list(refs)
    hbuf = refs.pop()
    c_scr = refs.pop()
    h_scr = refs.pop()
    c_out_ref = refs.pop()
    h_out_ref = refs.pop()
    out_ref = refs.pop()
    it = iter(refs)
    gx_ref = next(it)
    wp_ref = next(it)
    gnw_ref = next(it)
    gnb_ref = next(it)
    cnw_ref = next(it)
    cnb_ref = next(it)
    ew_ref = next(it)
    eb_ref = next(it) if has_bias else None
    ow_ref = next(it) if has_post_ln else None
    ob_ref = next(it) if has_post_ln else None

    H = hidden_dim
    B = brows
    chunk = pl.program_id(0)

    @pl.when(chunk == 0)
    def _init():
        h_scr[...] = jnp.zeros_like(h_scr)
        c_scr[...] = jnp.zeros_like(c_scr)

    # hoist invariant loads out of the time loop
    wp = wp_ref[...].astype(jnp.float32)
    gn_w = gnw_ref[...].astype(jnp.float32)
    gn_b = gnb_ref[...].astype(jnp.float32)
    cn_w = cnw_ref[...].astype(jnp.float32)
    cn_b = cnb_ref[...].astype(jnp.float32)

    t_base = chunk * tc

    def step(t, carry):
        h, c = carry
        row0 = t * B
        if not isinstance(row0, int):
            row0 = pl.multiple_of(row0, B)
        gates = gx_ref[pl.ds(row0, B), :].astype(jnp.float32) + jnp.dot(
            h, wp, preferred_element_type=jnp.float32)
        gates = _layernorm(gates, gn_w, gn_b, eps)
        # gate columns were pre-permuted to [i | f | o | g]:
        #   one sigmoid over the contiguous 3H block, one tanh over H
        sig = jax.nn.sigmoid(gates[:, 0:3 * H])
        g_t = jnp.tanh(gates[:, 3 * H:4 * H])
        c_new = sig[:, H:2 * H] * c + sig[:, 0:H] * g_t
        c_new = _layernorm(c_new, cn_w, cn_b, eps)
        h_new = sig[:, 2 * H:3 * H] * jnp.tanh(c_new)
        # store for the epilogue matmul (off the serial dependency chain)
        hbuf[pl.ds(row0, B), :] = h_new
        if needs_mask:  # padded timesteps must not advance the carried state
            valid = (t_base + t) < t_valid
            h_new = jnp.where(valid, h_new, h)
            c_new = jnp.where(valid, c_new, c)
        return (h_new, c_new)

    h, c = jax.lax.fori_loop(0, tc, step, (h_scr[...], c_scr[...]),
                             unroll=unroll)
    # scratch written once per chunk (carries state to the next chunk)
    h_scr[...] = h
    c_scr[...] = c

    # ---- epilogue: bulk MXU work on the whole chunk (overlaps next chunk) ----
    y = jnp.dot(hbuf[...], ew_ref[...].astype(jnp.float32),
                preferred_element_type=jnp.float32)
    if has_bias:
        y = y + eb_ref[...].astype(jnp.float32)
    if has_post_ln:
        y = _layernorm(y, ow_ref[...].astype(jnp.float32),
                       ob_ref[...].astype(jnp.float32), eps)
    out_ref[...] = y.astype(out_ref.dtype)

    # final state written only once, on the last chunk, from registers
    @pl.when(chunk == pl.num_programs(0) - 1)
    def _final():
        h_out_ref[...] = h.astype(h_out_ref.dtype)
        c_out_ref[...] = c.astype(c_out_ref.dtype)


def lstm_fused(gates_x2d, wp, gn_w, gn_b, cn_w, cn_b, ew, *, eb=None,
               post_ln=None, hidden_dim, brows, tc, t_valid, eps,
               out_dtype=None):
    TB, H4 = gates_x2d.shape
    H = hidden_dim
    B = brows
    T_pad = TB // B
    n_chunks = T_pad // tc
    Dout = ew.shape[1]
    out_dtype = out_dtype or gates_x2d.dtype

    inputs = [gates_x2d, wp, gn_w.reshape(1, -1), gn_b.reshape(1, -1),
              cn_w.reshape(1, -1), cn_b.reshape(1, -1), ew]
    in_specs = [
        pl.BlockSpec((tc * B, H4), lambda c: (c, 0)),
        pl.BlockSpec((H, H4), lambda c: (0, 0)),
        pl.BlockSpec((1, H4), lambda c: (0, 0)),
        pl.BlockSpec((1, H4), lambda c: (0, 0)),
        pl.BlockSpec((1, H), lambda c: (0, 0)),
        pl.BlockSpec((1, H), lambda c: (0, 0)),
        pl.BlockSpec((H, Dout), lambda c: (0, 0)),
    ]
    if eb is not None:
        inputs.append(eb.reshape(1, -1))
        in_specs.append(pl.BlockSpec((1, Dout), lambda c: (0, 0)))
    if post_ln is not None:
        ow, ob = post_ln
        inputs += [ow.reshape(1, -1), ob.reshape(1, -1)]
        in_specs += [pl.BlockSpec((1, Dout), lambda c: (0, 0))] * 2

    kernel = functools.partial(
        lstm_fused_kernel, eps=eps, hidden_dim=H, brows=B, tc=tc,
        t_valid=t_valid, needs_mask=(T_pad != t_valid),
        unroll=_unroll_factor(B, H4, tc),
        has_bias=eb is not None, has_post_ln=post_ln is not None)

    out, h_last, c_last = pl.pallas_call(
        kernel,
        grid=(n_chunks,),
        in_specs=in_specs,
        out_specs=[
            pl.BlockSpec((tc * B, Dout), lambda c: (c, 0)),
            pl.BlockSpec((B, H), lambda c: (0, 0)),
            pl.BlockSpec((B, H), lambda c: (0, 0)),
        ],
        out_shape=[
            jax.ShapeDtypeStruct((T_pad * B, Dout), out_dtype),
            jax.ShapeDtypeStruct((B, H), gates_x2d.dtype),
            jax.ShapeDtypeStruct((B, H), gates_x2d.dtype),
        ],
        scratch_shapes=[
            pltpu.VMEM((B, H), jnp.float32),        # h carry across chunks
            pltpu.VMEM((B, H), jnp.float32),        # c carry across chunks
            pltpu.VMEM((tc * B, H), jnp.float32),   # chunk h buffer for epilogue
        ],
        compiler_params=pltpu.CompilerParams(
            dimension_semantics=("arbitrary",),
            vmem_limit_bytes=_VMEM_LIMIT),
    )(*inputs)
    return out, h_last, c_last


# ----------------------------------------------------------------------------
# Full RNNTPredictor forward (state=None path, as in the reference call)
# ----------------------------------------------------------------------------
def rnnt_predictor_forward(tokens, params, hidden_dim, eps):
    # tokens: (B, U) int32
    B, U = tokens.shape
    H = hidden_dim
    L = len(params["lstm"])

    # pad batch to a multiple of 8 sublanes (padded rows sliced off later;
    # all ops are per-row so they never affect real rows)
    Bp = ((B + 7) // 8) * 8
    if Bp != B:
        tokens_p = jnp.concatenate(
            [tokens, jnp.zeros((Bp - B, U), tokens.dtype)], axis=0)
    else:
        tokens_p = tokens

    tokens_tb = tokens_p.T                                   # (U, Bp)
    # TODO(synk): embedding gather stays in plain JAX/XLA; an in-kernel gather
    # would need scalar-prefetched ids + per-row DMA and is not worth it here.
    emb = jnp.take(params["emb"], tokens_tb, axis=0)         # (U, Bp, E)
    E = emb.shape[-1]
    x2d = emb.reshape(U * Bp, E)

    # host-side one-time gate-column permutation [i, f, g, o] -> [i, f, o, g]
    # (LayerNorm over 4H is permutation-equivariant when its affine params are
    #  permuted identically, so this is exact)
    def perm_g(a):
        i, f, g, o = jnp.split(a, 4, axis=-1)
        return jnp.concatenate([i, f, o, g], axis=-1)

    lstm_p = []
    for lp in params["lstm"]:
        lstm_p.append(dict(
            wx=perm_g(lp["wx"]), wp=perm_g(lp["wp"]),
            gn_w=perm_g(lp["gn_w"]), gn_b=perm_g(lp["gn_b"]),
            cn_w=lp["cn_w"], cn_b=lp["cn_b"]))

    # kernel 1: input LayerNorm + emb @ wx0 (one big row-parallel matmul)
    gates = fused_rowwise(
        x2d, lstm_p[0]["wx"],
        pre_ln=(params["in_ln_w"], params["in_ln_b"]), eps=eps)

    # pad time up to a multiple of the chunk (time-major rows -> append rows);
    # padded steps are masked inside the recurrence so state stays correct
    tc = _time_chunk(U)
    T_pad = ((U + tc - 1) // tc) * tc
    if T_pad != U:
        gates = jnp.concatenate(
            [gates, jnp.zeros(((T_pad - U) * Bp, gates.shape[1]), gates.dtype)],
            axis=0)

    state_out = []
    x = gates
    for l in range(L):
        lp = lstm_p[l]
        if l + 1 < L:
            # epilogue emits the NEXT layer's gates_x directly (no h_seq HBM
            # round trip); dropout is identity (lstm_dropout=0.0 / eval)
            ew, eb, post_ln = lstm_p[l + 1]["wx"], None, None
        else:
            # last layer: epilogue is the final Linear + output LayerNorm
            ew, eb, post_ln = params["lin_w"], params["lin_b"], \
                (params["out_ln_w"], params["out_ln_b"])
        x, h_last, c_last = lstm_fused(
            x, lp["wp"], lp["gn_w"], lp["gn_b"], lp["cn_w"], lp["cn_b"],
            ew, eb=eb, post_ln=post_ln, hidden_dim=H, brows=Bp, tc=tc,
            t_valid=U, eps=eps)
        state_out.append((h_last[:B], c_last[:B]))

    D = params["lin_w"].shape[1]
    y = x.reshape(T_pad, Bp, D)[:U, :B]                      # drop padding
    # TODO(synk): fold this (U,B,D)->(B,U,D) transpose into the last kernel's
    # out_spec (needs an in-kernel (tc,B,D)->(B,tc,D) relayout); kept in XLA.
    return y.transpose(1, 0, 2), state_out


# ----------------------------------------------------------------------------
# Pure-JAX reference (mirrors the PyTorch forward) for a correctness check
# ----------------------------------------------------------------------------
def _ln_ref(x, w, b, eps):
    mu = x.mean(-1, keepdims=True)
    var = ((x - mu) ** 2).mean(-1, keepdims=True)
    return (x - mu) / jnp.sqrt(var + eps) * w + b


def rnnt_predictor_ref(tokens, params, hidden_dim, eps):
    H = hidden_dim
    x = jnp.take(params["emb"], tokens.T, axis=0)
    x = _ln_ref(x, params["in_ln_w"], params["in_ln_b"], eps)
    for lp in params["lstm"]:
        T, B, _ = x.shape
        h = jnp.zeros((B, H), x.dtype)
        c = jnp.zeros((B, H), x.dtype)
        gated = x @ lp["wx"]
        outs = []
        for t in range(T):
            g = gated[t] + h @ lp["wp"]
            g = _ln_ref(g, lp["gn_w"], lp["gn_b"], eps)
            i_g = jax.nn.sigmoid(g[:, :H])
            f_g = jax.nn.sigmoid(g[:, H:2 * H])
            c_g = jnp.tanh(g[:, 2 * H:3 * H])
            o_g = jax.nn.sigmoid(g[:, 3 * H:])
            c = f_g * c + i_g * c_g
            c = _ln_ref(c, lp["cn_w"], lp["cn_b"], eps)
            h = o_g * jnp.tanh(c)
            outs.append(h)
        x = jnp.stack(outs, 0)
    y = x @ params["lin_w"] + params["lin_b"]
    y = _ln_ref(y, params["out_ln_w"], params["out_ln_b"], eps)
    return y.transpose(1, 0, 2)


# ----------------------------------------------------------------------------
# main
# ----------------------------------------------------------------------------
if __name__ == "__main__":
    # small config consistent with the module
    VOCAB = 100
    EMB = 32            # token_embedding_dim
    HID = 32            # lstm_hidden_dim
    NUM_LAYERS = 2
    D_MODEL = 64
    EPS = 1e-5
    B, U = 2, 8

    key = jax.random.PRNGKey(0)
    ks = iter(jax.random.split(key, 32))

    def w(shape, scale=0.1):
        return (scale * jax.random.normal(next(ks), shape)).astype(jnp.float32)

    params = {
        "emb": w((VOCAB, EMB)),
        "in_ln_w": jnp.ones((EMB,), jnp.float32),
        "in_ln_b": jnp.zeros((EMB,), jnp.float32),
        "lstm": [],
        "lin_w": w((HID, D_MODEL)),
        "lin_b": w((D_MODEL,)),
        "out_ln_w": jnp.ones((D_MODEL,), jnp.float32),
        "out_ln_b": jnp.zeros((D_MODEL,), jnp.float32),
    }
    for layer_idx in range(NUM_LAYERS):
        din = EMB if layer_idx == 0 else HID
        params["lstm"].append({
            "wx": w((din, 4 * HID)),      # x2g (no bias: layer_norm=True)
            "wp": w((HID, 4 * HID)),      # p2g (no bias)
            "gn_w": jnp.ones((4 * HID,), jnp.float32),
            "gn_b": jnp.zeros((4 * HID,), jnp.float32),
            "cn_w": jnp.ones((HID,), jnp.float32),
            "cn_b": jnp.zeros((HID,), jnp.float32),
        })

    tokens = jax.random.randint(next(ks), (B, U), 0, VOCAB, dtype=jnp.int32)

    out, state_out = rnnt_predictor_forward(tokens, params, HID, EPS)
    out = jax.block_until_ready(out)
    assert out.shape == (B, U, D_MODEL), out.shape
    assert len(state_out) == NUM_LAYERS
    assert state_out[0][0].shape == (B, HID) and state_out[0][1].shape == (B, HID)

    ref = rnnt_predictor_ref(tokens, params, HID, EPS)
    assert jnp.allclose(out, ref, atol=1e-4, rtol=1e-4), float(jnp.abs(out - ref).max())

    print("KERNEL_OK")
</pallas_src>

<mosaic_0001>
module attributes {stable_mosaic.version = 11 : i64} {
  func.func @fused_rowwise_kernel(%arg0: i32, %arg1: memref<32x32xf32, #tpu.memory_space<vmem>>, %arg2: memref<32x128xf32, #tpu.memory_space<vmem>>, %arg3: memref<1x32xf32, #tpu.memory_space<vmem>>, %arg4: memref<1x32xf32, #tpu.memory_space<vmem>>, %arg5: memref<32x128xf32, #tpu.memory_space<vmem>>) attributes {dimension_semantics = [#tpu.dimension_semantics<parallel>], iteration_bounds = array<i64: 2>, scalar_prefetch = 0 : i64, scratch_operands = 0 : i64, tpu.core_type = #tpu.core_type<tc>, window_params = [{transform_indices = @transform_0, window_bounds = array<i64: 32, 32>}, {pipeline_mode = #tpu.pipeline_mode<synchronous>, transform_indices = @transform_1, window_bounds = array<i64: 32, 128>}, {pipeline_mode = #tpu.pipeline_mode<synchronous>, transform_indices = @transform_2, window_bounds = array<i64: 1, 32>}, {pipeline_mode = #tpu.pipeline_mode<synchronous>, transform_indices = @transform_3, window_bounds = array<i64: 1, 32>}, {transform_indices = @transform_4, window_bounds = array<i64: 32, 128>}]} {
    %c0 = arith.constant 0 : index
    %c0_0 = arith.constant 0 : index
    %0 = vector.load %arg1[%c0, %c0_0] : memref<32x32xf32, #tpu.memory_space<vmem>>, vector<32x32xf32>
    %c0_1 = arith.constant 0 : index
    %c0_2 = arith.constant 0 : index
    %1 = vector.load %arg3[%c0_1, %c0_2] : memref<1x32xf32, #tpu.memory_space<vmem>>, vector<1x32xf32>
    %c0_3 = arith.constant 0 : index
    %c0_4 = arith.constant 0 : index
    %2 = vector.load %arg4[%c0_3, %c0_4] : memref<1x32xf32, #tpu.memory_space<vmem>>, vector<1x32xf32>
    %cst = arith.constant dense<0.000000e+00> : vector<32xf32>
    %3 = vector.multi_reduction <add>, %0, %cst [1] : vector<32x32xf32> to vector<32xf32>
    %4 = vector.shape_cast %3 : vector<32xf32> to vector<32x1xf32>
    %cst_5 = arith.constant 3.200000e+01 : f32
    %5 = vector.broadcast %cst_5 : f32 to vector<32x1xf32>
    %6 = arith.divf %4, %5 : vector<32x1xf32>
    %7 = arith.mulf %0, %0 : vector<32x32xf32>
    %cst_6 = arith.constant dense<0.000000e+00> : vector<32xf32>
    %8 = vector.multi_reduction <add>, %7, %cst_6 [1] : vector<32x32xf32> to vector<32xf32>
    %9 = vector.shape_cast %8 : vector<32xf32> to vector<32x1xf32>
    %cst_7 = arith.constant 3.200000e+01 : f32
    %10 = vector.broadcast %cst_7 : f32 to vector<32x1xf32>
    %11 = arith.divf %9, %10 : vector<32x1xf32>
    %12 = arith.mulf %6, %6 : vector<32x1xf32>
    %13 = arith.subf %11, %12 : vector<32x1xf32>
    %14 = vector.broadcast %6 : vector<32x1xf32> to vector<32x32xf32>
    %15 = arith.subf %0, %14 : vector<32x32xf32>
    %cst_8 = arith.constant 9.99999974E-6 : f32
    %16 = vector.broadcast %cst_8 : f32 to vector<32x1xf32>
    %17 = arith.addf %13, %16 : vector<32x1xf32>
    %18 = math.rsqrt %17 : vector<32x1xf32>
    %19 = vector.broadcast %18 : vector<32x1xf32> to vector<32x32xf32>
    %20 = arith.mulf %15, %19 : vector<32x32xf32>
    %21 = vector.broadcast %1 : vector<1x32xf32> to vector<32x32xf32>
    %22 = arith.mulf %20, %21 : vector<32x32xf32>
    %23 = vector.broadcast %2 : vector<1x32xf32> to vector<32x32xf32>
    %24 = arith.addf %22, %23 : vector<32x32xf32>
    %c0_9 = arith.constant 0 : index
    %c0_10 = arith.constant 0 : index
    %25 = vector.load %arg2[%c0_9, %c0_10] : memref<32x128xf32, #tpu.memory_space<vmem>>, vector<32x128xf32>
    %cst_11 = arith.constant dense<0.000000e+00> : vector<32x128xf32>
    %26 = tpu.matmul %24, %25, %cst_11 {dimension_numbers = #tpu.dot_dimension_numbers<[1], [0], [0], [1], [0, 0, 1, 1], [], []>} : vector<32x32xf32>, vector<32x128xf32>, vector<32x128xf32> -> vector<32x128xf32>
    %c0_12 = arith.constant 0 : index
    %c0_13 = arith.constant 0 : index
    %27 = vector.load %arg5[%c0_12, %c0_13] : memref<32x128xf32, #tpu.memory_space<vmem>>, vector<32x128xf32>
    tpu.vector_store %arg5[%c0_12, %c0_13], %26 {strides = array<i32>} : memref<32x128xf32, #tpu.memory_space<vmem>>, vector<32x128xf32>,
    return
  }
  func.func @transform_0(%arg0: i32) -> (i32, i32) {
    %c0_i32 = arith.constant 0 : i32
    %c0_i32_0 = arith.constant 0 : i32
    return %arg0, %c0_i32 : i32, i32
  }
  func.func @transform_1(%arg0: i32) -> (i32, i32) {
    %c0_i32 = arith.constant 0 : i32
    %c0_i32_0 = arith.constant 0 : i32
    %c0_i32_1 = arith.constant 0 : i32
    return %c0_i32, %c0_i32_0 : i32, i32
  }
  func.func @transform_2(%arg0: i32) -> (i32, i32) {
    %c0_i32 = arith.constant 0 : i32
    %c0_i32_0 = arith.constant 0 : i32
    %c0_i32_1 = arith.constant 0 : i32
    return %c0_i32, %c0_i32_0 : i32, i32
  }
  func.func @transform_3(%arg0: i32) -> (i32, i32) {
    %c0_i32 = arith.constant 0 : i32
    %c0_i32_0 = arith.constant 0 : i32
    %c0_i32_1 = arith.constant 0 : i32
    return %c0_i32, %c0_i32_0 : i32, i32
  }
  func.func @transform_4(%arg0: i32) -> (i32, i32) {
    %c0_i32 = arith.constant 0 : i32
    %c0_i32_0 = arith.constant 0 : i32
    return %arg0, %c0_i32 : i32, i32
  }
}

</mosaic_0001>

<bundles_post_ra>
// kernel: tpu_custom_call.1
= control target key start
LH: loop header
LB: loop body
LE: loop exit
PB: predicated region body
PF: predicated region fallthrough
CT: control target
= control target key end

     0   :  { %9 = vsyncpa [#allocation3], 0  ;;  %s818_s0 = inlined_call_operand.vmem [shape: f32[64,32], index: 0, kind: input, shape index: {}]   ;;  %s819_s1 = inlined_call_operand.vmem [shape: f32[32,128], index: 1, kind: input, shape index: {}]   ;;  %s820_s2 = inlined_call_operand.vmem [shape: f32[1,32], index: 2, kind: input, shape index: {}]   ;;  %s821_s3 = inlined_call_operand.vmem [shape: f32[1,32], index: 3, kind: input, shape index: {}]   ;;  %s822_s4 = inlined_call_operand.hbm [shape: f32[64,128], index: 4, kind: output, shape index: {}]  }
   0x1   :  { %11 = vsyncpa [#allocation3 + $0x1], 0  ;;  %s662_s15 = smov 0   ;;  %s664_s16 = smov 0  }
   0x2   :  { %s666_s17 = smov 0   ;;  %s668_s18 = smov 0  }
   0x3 LB: > { %s683_s19 = sadd.s32 4294967295, %s632_s18   ;;  %s468_s20 = sadd.s32 4294967294, %s632_s18   ;;  %s632_s18 = sphi %s668_s18, %s828_s18   ;;  %s628_s17 = sphi %s666_s17, %s827_s17   ;;  %s624_s16 = sphi %s664_s16, %s826_s16   ;;  %s620_s15 = sphi %s662_s15, %s825_s15  }
   0x4   : > { %s687_s21 = sadd.s32 1, %s632_s18   ;;  %s113_s22 = sadd.s32 1, %s628_s17 }
   0x5   : > { %s110_s23 = ssub.s32 %s632_s18, %s687_s21  ;;  %p123_p0 = scmp.ne.s32.totalorder %s628_s17, %s624_s16 }
   0x6   : > { %p111_p1 = scmp.eq.s32.totalorder %s110_s23, 0  ;;  %p124_p2 = scmp.eq.s32.totalorder %s683_s19, 1 }
   0x7   : > { %p129_p3 = scmp.ne.s32.totalorder %s624_s16, %s620_s15  ;;  %p130_p4 = scmp.eq.s32.totalorder %s468_s20, 1 }
   0x8   : > { %s698_s24 = scalar_select %p111_p1, %s628_s17, %s113_s22  }
   0x9   : > { %p700_p5 = por %p124_p2, %p123_p0  ;;  %p704_p6 = por %p130_p4, %p129_p3 }
   0xa   : > { %p471_p7 = scmp.ge.s32.totalorder %s632_s18, 1  ;;  %p166_p8 = scmp.lt.s32.totalorder %s632_s18, 3 }
   0xc   : > { %p167_p9 = pnand %p471_p7, %p166_p8 }
   0xd   : > { %s473_s27 = sshll.u32 (!%p167_p9), %s683_s19, 2  ;;  %vm205_vm0 = vcmask (!%p167_p9), 261120   ;;  %v287_v16 = vld [vmem:[%s819_s1] sm:$0xff] (!%p167_p9)  ;;  %v288_v17 = vld [vmem:[%s819_s1 + $0x8] sm:$0xff] (!%p167_p9)  ;;  %v289_v18 = vld [vmem:[%s819_s1 + $0x10] sm:$0xff] (!%p167_p9)  ;;  %s634_s10 = smov (!%p167_p9), [#allocation2]  }
   0xe   : > { %170 = sbr.rel (%p167_p9) target bundleno = 432 (0x1b0), region = 36  ;;  %p193_p10 = scmp.lt.s32.totalorder (!%p167_p9), %s473_s27, 7  ;;  %v509_v19 = vpack.c.bf16 (!%p167_p9), %v288_v17, %v287_v16  ;;  %v290_v20 = vld [vmem:[%s819_s1 + $0x18] sm:$0xff] (!%p167_p9)  ;;  %v475_v53 = vld [vmem:[%s820_s2] ss:$0 sm:$0xff] (!%p167_p9) }
   0xf   : > { %v513_v21 = vpack.c.bf16 (!%p167_p9), %v290_v20, %v289_v18  ;;  %v476_v56 = vld [vmem:[%s821_s3] ss:$0 sm:$0xff] (!%p167_p9)  ;;  %s574_s11 = sshll.u32 (!%p167_p9), %s634_s10, 4  ;;  %s575_s11 = int_to_ptr.vmem [resolvable:$false] %s574_s11 }
  0x10   : > { %510 = vmatprep.subr.bf16.mxu0 (!%p167_p9), %v509_v19  ;;  %517 = vmatprep.subr.bf16.mxu1 (!%p167_p9), %v509_v19  ;;  %s576_s12 = scalar_lea.vmem (!%p167_p9), %s575_s11, 1024 }
  0x11   : > { %512 = vmatpush3.bf16.msra.mxu0 (!%p167_p9), %v509_v19  ;;  %519 = vmatpush3.bf16.msra.mxu1 (!%p167_p9), %v509_v19 }
  0x12   : > { %514 = vmatprep.subr.bf16.mxu0 (!%p167_p9), %v513_v21  ;;  %518 = vmatprep.subr.bf16.mxu1 (!%p167_p9), %v513_v21 }
  0x15   : > { %s830_s27 = smov (!%p193_p10, %s473_s27), 7  ;;  %516 = vmatpush3.bf16.msra.mxu0 %v513_v21  ;;  %520 = vmatpush3.bf16.msra.mxu1 %v513_v21 }
  0x16   : > { %s474_s28 = sshll.u32 %s830_s27, 3  ;;  %s189_s27 = sand.u32 1, %s624_s16  }
  0x17   : > { %s196_s5 = scalar_lea.vmem %s818_s0, %s474_s28  ;;  %s472_s28 = sshll.u32 %s189_s27, 5 }
  0x18   : > { %v714_v0 = vld [vmem:[%s196_s5 + $0x8] sm:$0xff]  ;;  %v716_v1 = vld [vmem:[%s196_s5] sm:$0xff]  ;;  %v718_v2 = vld [vmem:[%s196_s5 + $0x18] sm:$0xff]  ;;  %s191_s29 = scalar_lea.vmem [#allocation2], %s472_s28  ;;  %s777_s9 = scalar_lea.sflag [#allocation3], %s189_s27 }
  0x19   : > { %v209_v3 = vsel %vm205_vm0, %v714_v0, 0.0  ;;  %v206_v4 = vsel %vm205_vm0, %v716_v1, 0.0  ;;  %v724_v5 = vld [vmem:[%s196_s5 + $0x10] sm:$0xff]  ;;  %v215_v6 = vsel %vm205_vm0, %v718_v2, 0.0  ;;  %v223_v9 = vmul.f32 %v716_v1, %v716_v1  ;;  %s406_s30 = sshll.u32 %s191_s29, 4  ;;  %s486_s5 = sshll.u32 %s683_s19, 9  ;;  %s770_s30 = int_to_ptr.vmem [resolvable:$true] %s406_s30 }
  0x1a   : > { %210 = vadd.xlane.f32.xlu1 %v209_v3  ;;  %207 = vadd.xlane.f32.xlu0 %v206_v4  ;;  %v212_v7 = vsel %vm205_vm0, %v724_v5, 0.0  ;;  %v225_v8 = vmul.f32 %v724_v5, %v724_v5  ;;  %v226_v12 = vmul.f32 %v718_v2, %v718_v2  ;;  %v224_v13 = vmul.f32 %v714_v0, %v714_v0  ;;  %s775_s8 = scalar_lea.hbm %s822_s4, %s486_s5  ;;  %s570_s19 = scalar_lea.vmem %s770_s30, 512 }
  0x1b   : > { %v227_v11 = vsel %vm205_vm0, %v223_v9, 0.0  ;;  %p571_p11 = scmp.ne.s32.totalorder %s770_s30, %s570_s19  ;;  %p577_p0 = scmp.lt.s32.totalorder %s770_s30, %s575_s11 }
  0x1c   : > { %v233_v10 = vsel %vm205_vm0, %v225_v8, 0.0  ;;  %v236_v14 = vsel %vm205_vm0, %v226_v12, 0.0  ;;  %v230_v15 = vsel %vm205_vm0, %v224_v13, 0.0  ;;  %p578_p1 = scmp.lt.s32.totalorder %s576_s12, %s570_s19 }
  0x1d   : > { %p572_p12 = pnand %p571_p11, %p700_p5 }
  0x1e   : > { %216 = vadd.xlane.f32.xlu1 %v215_v6  ;;  %213 = vadd.xlane.f32.xlu0 %v212_v7  ;;  %p579_p2 = por %p578_p1, %p577_p0 }
  0x1f   : > { %p573_p13 = pneg %p572_p12 }
  0x21   : > { %p580_p3 = pnand %p579_p2, %p573_p13 }
  0x22   : > { %234 = vadd.xlane.f32.xlu1 %v233_v10  ;;  %228 = vadd.xlane.f32.xlu0 %v227_v11 }
  0x26   : > { %237 = vadd.xlane.f32.xlu1 %v236_v14  ;;  %231 = vadd.xlane.f32.xlu0 %v230_v15 }
  0xa7   : > { %v211_v22 = vpop.xlane.xlu1 %210  ;;  %v208_v23 = vpop.xlane.xlu0 %207 }
  0xa8   : > { %v219_v26 = vmul.f32 0.03125, %v208_v23  ;;  %v220_v28 = vmul.f32 0.03125, %v211_v22 }
  0xaa   : > { %v243_v32 = vmul.f32 %v219_v26, %v219_v26  ;;  %v244_v38 = vmul.f32 %v220_v28, %v220_v28  ;;  %v251_v52 = vsub.f32 %v716_v1, %v219_v26  ;;  %v252_v61 = vsub.f32 %v714_v0, %v220_v28 }
  0xab   : > { %v217_v24 = vpop.xlane.xlu1 %216  ;;  %v214_v25 = vpop.xlane.xlu0 %213 }
  0xac   : > { %v221_v27 = vmul.f32 0.03125, %v214_v25  ;;  %v222_v29 = vmul.f32 0.03125, %v217_v24 }
  0xae   : > { %v245_v33 = vmul.f32 %v221_v27, %v221_v27  ;;  %v246_v39 = vmul.f32 %v222_v29, %v222_v29  ;;  %v253_v50 = vsub.f32 %v724_v5, %v221_v27  ;;  %v254_v58 = vsub.f32 %v718_v2, %v222_v29 }
  0xaf   : > { %v235_v30 = vpop.xlane.xlu1 %234  ;;  %v229_v31 = vpop.xlane.xlu0 %228 }
  0xb0   : > { %v241_v34 = vmul.f32 0.03125, %v235_v30  ;;  %v239_v35 = vmul.f32 0.03125, %v229_v31 }
  0xb2   : > { %v249_v36 = vsub.f32 %v241_v34, %v245_v33  ;;  %v247_v37 = vsub.f32 %v239_v35, %v243_v32 }
  0xb3   : > { %v238_v40 = vpop.xlane.xlu1 %237  ;;  %v232_v41 = vpop.xlane.xlu0 %231 }
  0xb4   : > { %v257_v42 = vadd.f32 1e-05, %v249_v36  ;;  %v255_v43 = vadd.f32 1e-05, %v247_v37  ;;  %v242_v44 = vmul.f32 0.03125, %v238_v40  ;;  %v240_v45 = vmul.f32 0.03125, %v232_v41 }
  0xb6   : > { %562 = vrsqrt.f32 %v257_v42  ;;  %v250_v46 = vsub.f32 %v242_v44, %v246_v39  ;;  %v248_v47 = vsub.f32 %v240_v45, %v244_v38 }
  0xb7   : > { %564 = vrsqrt.f32 %v255_v43 }
  0xb8   : > { %v258_v48 = vadd.f32 1e-05, %v250_v46  ;;  %v256_v49 = vadd.f32 1e-05, %v248_v47 }
  0xba   : > { %566 = vrsqrt.f32 %v258_v48 }
  0xbb   : > { %568 = vrsqrt.f32 %v256_v49 }
  0xc0   : > { %v563_v51 = vpop.eup %562 }
  0xc1   : > { %v565_v54 = vpop.eup %564  ;;  %v265_v55 = vmul.f32 %v563_v51, %v253_v50 }
  0xc2   : > { %v263_v57 = vmul.f32 %v565_v54, %v251_v52 }
  0xc3   : > { %v275_v59 = vmul.f32 %v475_v53, %v265_v55 }
  0xc4   : > { %v567_v60 = vpop.eup %566  ;;  %v273_v62 = vmul.f32 %v475_v53, %v263_v57 }
  0xc5   : > { %v569_v63 = vpop.eup %568  ;;  %v285_v1 = vadd.f32 %v476_v56, %v275_v59  ;;  %v266_v3 = vmul.f32 %v567_v60, %v254_v58 }
  0xc6   : > { %v283_v4 = vadd.f32 %v476_v56, %v273_v62  ;;  %v264_v5 = vmul.f32 %v569_v63, %v252_v61 }
  0xc7   : > { %506 = vmatprep.mubr.msk.f32.mxu1 %vm205_vm0, %v285_v1  ;;  %v276_v6 = vmul.f32 %v475_v53, %v266_v3 }
  0xc8   : > { %503 = vmatprep.mubr.msk.f32.mxu0 %vm205_vm0, %v283_v4  ;;  %v274_v7 = vmul.f32 %v475_v53, %v264_v5 }
  0xc9   : > { %v286_v8 = vadd.f32 %v476_v56, %v276_v6 }
  0xca   : > { %v284_v2 = vadd.f32 %v476_v56, %v274_v7 }
  0xcb   : > { %507 = vmatmul.mubr.msk.f32.vlgmr.msra.gmra.mrb[0].mxu1 %vm205_vm0, %v286_v8 }
  0xcc   : > { %504 = vmatmul.mubr.msk.f32.vlgmr.msra.gmra.mrb[0].mxu0 %vm205_vm0, %v284_v2 }
 0x19e   : > { %v508_v0 = vpop.f32.mrb[0].mxu1 }
 0x19f   : > { %v505_v9 = vpop.f32.mrb[0].mxu0  ;;  %391 = vst [vmem:[%s191_s29 + $0x18] sm:$0xff] %v508_v0  ;;  %v379_v10 = vpop.f32.mrb[1].mxu1 }
 0x1a0   : > { %389 = vst [vmem:[%s191_s29 + $0x8] sm:$0xff] %v505_v9  ;;  %v369_v11 = vpop.f32.mrb[1].mxu0  ;;  %390 = vst [vmem:[%s191_s29 + $0x10] sm:$0xff] %v379_v10 }
 0x1a1   : > { %388 = vst [vmem:[%s191_s29] sm:$0xff] %v369_v11 }
 0x1a2   : > { %583 = shalt.err (!%p580_p3)
}
 0x1a3   : > { %s584_s13 = scalar_lea.hbm %s775_s8, 512  ;;  %s588_s22 = scalar_lea.hbm %s822_s4, 1024 }
 0x1a4   : > { %p585_p4 = scmp.ne.s32.totalorder %s775_s8, %s584_s13  ;;  %p589_p9 = scmp.lt.u32.totalorder %s775_s8, %s822_s4 }
 0x1a5   : > { %p590_p10 = scmp.lt.u32.totalorder %s588_s22, %s584_s13  ;;  %p592_p12 = scmp.lt.u32.totalorder %s584_s13, %s775_s8 }
 0x1a6   : > { %p586_p7 = pnand %p585_p4, %p700_p5 }
 0x1a7   : > { %p591_p11 = por %p590_p10, %p589_p9 }
 0x1a8   : > { %p587_p8 = pneg %p586_p7 }
 0x1a9   : > { %p593_p13 = por %p592_p12, %p591_p11 }
 0x1ab   : > { %p594_p0 = pnand %p593_p13, %p587_p8 }
 0x1ad   : > { %597 = shalt.err (!%p594_p0)
}
 0x1ae   : > { %s635_s28 = smov 128   ;;  %s636_s29 = smov 8  }
 0x1af   : > { %521 = dma.vmem_to_hbm [thread:$0]  (%p700_p5), %s770_s30, 512, %s775_s8, %s777_s9, %s635_s28, %s635_s28, %s636_s29  }
 0x1b0 PF: > { %p527_p1 = scmp.ge.s32.totalorder %s632_s18, 2  ;;  %s421_s5 = sand.u32 1, %s620_s15  }
 0x1b1   : > { %s422_s6 = scalar_lea.sflag [#allocation3], %s421_s5 }
 0x1b2   : > { %p524_p2 = pnand %p527_p1, %p704_p6 }
 0x1b4   : > { %615 = dma.done.wait (!%p524_p2), %s422_s6, 512  }
 0x1b5   : > { %617 = vsyncadd (!%p524_p2), %s422_s6, 4294966784  ;;  %p14_p3 = scmp.ge.s32.totalorder %s687_s21, 4   ;;  %s825_s15 = smov %s624_s16 }
 0x1b6   : > { %s826_s16 = smov %s628_s17  ;;  %s827_s17 = smov %s698_s24 }
 0x1b7   : > { %s828_s18 = smov %s687_s21  ;;  %16 = sbr.rel (!%p14_p3) target bundleno = 3 (0x3), region = 71 }
 0x1be   :  { %427 = vsyncpa [#allocation3], 1 }
 0x1bf   :  { %429 = vsyncpa [#allocation3 + $0x1], 1 }

</bundles_post_ra>
